<compile_context>
chip_gen: v6e
topology: v6e:2x2x1
jax: 0.10.0
libtpu: 0.0.40
codegen_flags: <defaults>
</compile_context>

<pallas_src>
import jax
import jax.numpy as jnp
from jax.experimental import pallas as pl
from jax.experimental.pallas import tpu as pltpu


def _drop_path_kernel(x_ref, s_ref, o_ref):
    # x_ref: (TB, TF) block of the flattened input.
    # s_ref: (TB, 1) per-sample scale (0 or 1/keep_prob), broadcast over TF.
    x = x_ref[...].astype(jnp.float32)
    o_ref[...] = (x * s_ref[...]).astype(o_ref.dtype)


def _tile(dim, target, align):
    """Largest legal block size <= target for a dimension of size `dim`."""
    if dim <= target:
        return dim                      # full extent is always a legal block
    return max(align, (target // align) * align)


def drop_path(x, key, drop_prob=0.0, training=False, scale_by_keep=True,
              *, row_tile=256, col_tile=2048):
    """Per-sample stochastic depth. x: (B, ...). Returns same shape/dtype."""
    if drop_prob == 0.0 or not training:
        return x                        # PyTorch short-circuit: identity

    keep_prob = 1.0 - drop_prob
    B = x.shape[0]
    F = 1
    for d in x.shape[1:]:
        F *= d

    # O(B) per-sample Bernoulli mask + optional 1/keep_prob scaling (glue).
    mask = jax.random.bernoulli(key, keep_prob, (B,)).astype(jnp.float32)
    if keep_prob > 0.0 and scale_by_keep:
        scale = mask / keep_prob
    else:
        scale = mask
    scale2 = scale.reshape(B, 1)

    # Row-major reshape: no data movement, no extra HBM traffic.
    x2 = x.reshape(B, F)

    TB = _tile(B, row_tile, 8)          # sublane-aligned row (sample) tile
    TF = _tile(F, col_tile, 128)        # lane-dense feature tile
    grid = (pl.cdiv(B, TB), pl.cdiv(F, TF))

    itemsize = jnp.dtype(x.dtype).itemsize
    cost = pl.CostEstimate(
        flops=B * F,                                 # one multiply per element
        transcendentals=0,
        bytes_accessed=2 * B * F * itemsize + B * 4,  # read x, write out, scale
    )

    out = pl.pallas_call(
        _drop_path_kernel,
        out_shape=jax.ShapeDtypeStruct((B, F), x.dtype),
        grid_spec=pltpu.PrefetchScalarGridSpec(
            num_scalar_prefetch=0,
            grid=grid,
            in_specs=[
                pl.BlockSpec((TB, TF), lambda i, j: (i, j)),
                pl.BlockSpec((TB, 1), lambda i, j: (i, 0)),
            ],
            out_specs=pl.BlockSpec((TB, TF), lambda i, j: (i, j)),
        ),
        compiler_params=pltpu.CompilerParams(
            dimension_semantics=("parallel", "parallel"),
            vmem_limit_bytes=32 * 1024 * 1024,
        ),
        cost_estimate=cost,
    )(x2, scale2)

    return out.reshape(x.shape)


if __name__ == "__main__":
    key = jax.random.PRNGKey(0)
    kx, kmask, kx2, kmask2 = jax.random.split(key, 4)

    # Small shapes consistent with the module: (batch=2, seq=8, hidden=32).
    B, S, D = 2, 8, 32
    drop_prob = 0.25
    keep_prob = 1.0 - drop_prob
    x = jax.random.normal(kx, (B, S, D), dtype=jnp.float32)

    # 1) training path (kernel runs).
    out = drop_path(x, kmask, drop_prob=drop_prob, training=True,
                    scale_by_keep=True)
    out = jax.block_until_ready(out)

    mask = jax.random.bernoulli(kmask, keep_prob, (B,)).astype(jnp.float32)
    ref = x * (mask / keep_prob)[:, None, None]
    assert out.shape == x.shape and out.dtype == x.dtype
    assert jnp.allclose(out, ref, atol=1e-6, rtol=1e-6)

    # 2) eval / drop_prob=0 paths are identity (match PyTorch short-circuit).
    assert drop_path(x, kmask, drop_prob=drop_prob, training=False) is x
    assert drop_path(x, kmask, drop_prob=0.0, training=True) is x

    # 3) multi-tile grid with non-dividing tail blocks (exercise tiling/mask).
    B2, S2, D2 = 10, 6, 80              # F = 480
    x2 = jax.random.normal(kx2, (B2, S2, D2), dtype=jnp.float32)
    out2 = drop_path(x2, kmask2, drop_prob=drop_prob, training=True,
                     scale_by_keep=True, row_tile=8, col_tile=256)
    out2 = jax.block_until_ready(out2)
    mask2 = jax.random.bernoulli(kmask2, keep_prob, (B2,)).astype(jnp.float32)
    ref2 = x2 * (mask2 / keep_prob)[:, None, None]
    assert jnp.allclose(out2, ref2, atol=1e-6, rtol=1e-6)

    print("KERNEL_OK")
</pallas_src>

<mosaic_0001>
module attributes {stable_mosaic.version = 11 : i64} {
  func.func @_drop_path_kernel(%arg0: i32, %arg1: i32, %arg2: memref<2x256xf32, #tpu.memory_space<vmem>>, %arg3: memref<2x1xf32, #tpu.memory_space<vmem>>, %arg4: memref<2x256xf32, #tpu.memory_space<vmem>>) attributes {dimension_semantics = [#tpu.dimension_semantics<parallel>, #tpu.dimension_semantics<parallel>], iteration_bounds = array<i64: 1, 1>, scalar_prefetch = 0 : i64, scratch_operands = 0 : i64, tpu.core_type = #tpu.core_type<tc>, window_params = [{transform_indices = @transform_0, window_bounds = array<i64: 2, 256>}, {transform_indices = @transform_1, window_bounds = array<i64: 2, 1>}, {transform_indices = @transform_2, window_bounds = array<i64: 2, 256>}]} {
    %c0 = arith.constant 0 : index
    %c0_0 = arith.constant 0 : index
    %0 = vector.load %arg2[%c0, %c0_0] : memref<2x256xf32, #tpu.memory_space<vmem>>, vector<2x256xf32>
    %c0_1 = arith.constant 0 : index
    %c0_2 = arith.constant 0 : index
    %1 = vector.load %arg3[%c0_1, %c0_2] : memref<2x1xf32, #tpu.memory_space<vmem>>, vector<2x1xf32>
    %2 = vector.broadcast %1 : vector<2x1xf32> to vector<2x256xf32>
    %3 = arith.mulf %0, %2 : vector<2x256xf32>
    %c0_3 = arith.constant 0 : index
    %c0_4 = arith.constant 0 : index
    %4 = vector.load %arg4[%c0_3, %c0_4] : memref<2x256xf32, #tpu.memory_space<vmem>>, vector<2x256xf32>
    tpu.vector_store %arg4[%c0_3, %c0_4], %3 {strides = array<i32>} : memref<2x256xf32, #tpu.memory_space<vmem>>, vector<2x256xf32>,
    return
  }
  func.func @transform_0(%arg0: i32, %arg1: i32) -> (i32, i32) {
    %c0_i32 = arith.constant 0 : i32
    return %arg0, %arg1 : i32, i32
  }
  func.func @transform_1(%arg0: i32, %arg1: i32) -> (i32, i32) {
    %c0_i32 = arith.constant 0 : i32
    %c0_i32_0 = arith.constant 0 : i32
    return %arg0, %c0_i32 : i32, i32
  }
  func.func @transform_2(%arg0: i32, %arg1: i32) -> (i32, i32) {
    %c0_i32 = arith.constant 0 : i32
    return %arg0, %arg1 : i32, i32
  }
}

</mosaic_0001>

<bundles_post_ra>
// kernel: tpu_custom_call.1
= control target key start
LH: loop header
LB: loop body
LE: loop exit
PB: predicated region body
PF: predicated region fallthrough
CT: control target
= control target key end

     0   :  { %7 = vsyncpa [#allocation3], 0  ;;  %s132_s0 = inlined_call_operand.hbm [shape: f32[2,256], index: 0, kind: input, shape index: {}]   ;;  %s133_s1 = inlined_call_operand.vmem [shape: f32[2,1], index: 1, kind: input, shape index: {}]   ;;  %s134_s2 = inlined_call_operand.hbm [shape: f32[2,256], index: 2, kind: output, shape index: {}]  }
   0x1   :  { %8 = vsyncpa [#allocation4], 0  ;;  %s104_s9 = smov [#allocation2]  }
   0x2   :  { %s15_s10 = sshll.u32 %s104_s9, 4  ;;  %s16_s10 = int_to_ptr.vmem [resolvable:$true] %s15_s10 }
   0x3   :  { %s68_s11 = scalar_lea.vmem %s16_s10, 64  ;;  %p73_p1 = scmp.lt.s32.totalorder %s16_s10, %s16_s10 }
   0x4   :  { %p69_p0 = scmp.ne.s32.totalorder %s16_s10, %s68_s11  ;;  %p74_p2 = scmp.lt.s32.totalorder %s68_s11, %s68_s11 }
   0x6   :  { %p75_p3 = por %p74_p2, %p73_p1 }
   0x8   :  { %p76_p4 = pnand %p75_p3, %p69_p0 }
   0xa   :  { %79 = shalt.err (!%p76_p4)
}
   0xb   :  { %18 = dma.hbm_to_vmem [thread:$0]  %s132_s0, 64, %s16_s10, [#allocation3]  }
   0xc   :  { %100 = dma.done.wait [#allocation3], 64  }
   0xd   :  { %101 = vsyncadd [#allocation3], 4294967232  ;;  %v105_v0 = vmov 0   ;;  %v25_v1 = vld [vmem:[%s133_s1] sm:$0x3]  ;;  %v33_v4 = vlaneseq  ;;  %s107_s16 = smov [#allocation5]  }
   0xe   :  { %59 = vset.pattern.permute.xlu0 %v105_v0  ;;  %v106_v2 = vmov 269488144   ;;  %v24_v9 = vld [vmem:[#allocation2] sm:$0xf]  ;;  %s46_s17 = sshll.u32 %s107_s16, 4  ;;  %s47_s17 = int_to_ptr.vmem [resolvable:$true] %s46_s17 }
   0xf   :  { %28 = vperm.xlu0 %59, %v25_v1   ;;  %v31_v3 = vunpack.c.l.s4 %v106_v2  ;;  %v34_v6 = vshrl.u32 %v33_v4, 7  ;;  %s80_s0 = scalar_lea.vmem %s47_s17, 64  ;;  %p85_p6 = scmp.lt.s32.totalorder %s47_s17, %s47_s17 }
  0x10   :  { %p81_p5 = scmp.ne.s32.totalorder %s47_s17, %s80_s0  ;;  %p86_p7 = scmp.lt.s32.totalorder %s80_s0, %s80_s0 }
  0x11   :  { %v32_v5 = vunpack.c.0.s8 %v31_v3 }
  0x12   :  { %p87_p8 = por %p86_p7, %p85_p6 }
  0x13   :  { %v35_v7 = vsub.s32 %v32_v5, %v34_v6 }
  0x14   :  { %p88_p9 = pnand %p87_p8, %p81_p5 }
  0x8a   :  { %v29_v8 = vpop.permute.xlu0 %28 }
  0x8b   :  { %v36_v10 = vrot.slane %v29_v8, %v35_v7 }
  0x8d   :  { %v38_v11 = vmul.f32 %v36_v10, %v24_v9 }
  0x8f   :  { %39 = vst [vmem:[#allocation5] sm:$0xf] %v38_v11 }
  0x90   :  { %91 = shalt.err (!%p88_p9)
}
  0x91   :  { %49 = dma.vmem_to_hbm [thread:$0]  %s47_s17, 64, %s134_s2, [#allocation4]  }
  0x92   :  { %102 = dma.done.wait [#allocation4], 64  }
  0x93   :  { %103 = vsyncadd [#allocation4], 4294967232 }
  0x94   :  { %53 = vsyncpa [#allocation3], 1 }
  0x95   :  { %54 = vsyncpa [#allocation4], 1 }

</bundles_post_ra>
